<compile_context>
chip_gen: v7x
topology: tpu7x:2x2x1
jax: 0.10.0
libtpu: 0.0.40
codegen_flags: <defaults>
</compile_context>

<pallas_src>
import jax
import jax.numpy as jnp
from jax import lax
from jax.experimental import pallas as pl
from jax.experimental.pallas import tpu as pltpu


def _round_up(x, mult):
    return ((x + mult - 1) // mult) * mult


def _vmem():
    return pl.BlockSpec(memory_space=pltpu.MemorySpace.VMEM)


def _smem_out():
    return pl.BlockSpec(memory_space=pltpu.MemorySpace.SMEM)


# --------------------------------------------------------------------------
# Kernel 1: soft-token ("pos align" / labels) cross-entropy
#   grid over batch; lane-dense (padded) class dim; per-batch partial sums.
# --------------------------------------------------------------------------
def _pos_align_kernel(logits_ref, tsim_ref, eos_ref, out_ref):
    logits = logits_ref[0]                         # [Q, Cp] f32 (pad = -1e9)
    tsim = tsim_ref[0]                             # [Q, Cp]     (pad = 0)
    m = jnp.max(logits, axis=-1, keepdims=True)
    lse = jnp.log(jnp.sum(jnp.exp(logits - m), axis=-1, keepdims=True)) + m
    log_probs = logits - lse                       # log_softmax(-1)
    entropy = jnp.log(tsim + 1e-6) * tsim
    loss_q = jnp.sum(entropy - log_probs * tsim, axis=-1, keepdims=True)   # [Q,1]
    total = jnp.sum(loss_q * eos_ref[0])                                   # scalar
    out_ref[...] = jnp.full((1, 1, 128), total, jnp.float32)


def pos_align_loss(logits, target_sim, eos_map):
    B, Q, C = logits.shape
    Cp = max(128, _round_up(C, 128))
    logits_p = jnp.pad(logits.astype(jnp.float32),
                       ((0, 0), (0, 0), (0, Cp - C)), constant_values=-1e9)
    tsim_p = jnp.pad(target_sim.astype(jnp.float32),
                     ((0, 0), (0, 0), (0, Cp - C)))
    eos = eos_map.astype(jnp.float32).reshape(B, Q, 1)
    out = pl.pallas_call(
        _pos_align_kernel,
        out_shape=jax.ShapeDtypeStruct((B, 1, 128), jnp.float32),
        grid=(B,),
        in_specs=[pl.BlockSpec((1, Q, Cp), lambda b: (b, 0, 0)),
                  pl.BlockSpec((1, Q, Cp), lambda b: (b, 0, 0)),
                  pl.BlockSpec((1, Q, 1), lambda b: (b, 0, 0))],
        out_specs=pl.BlockSpec((1, 1, 128), lambda b: (b, 0, 0)),
        compiler_params=pltpu.CompilerParams(
            dimension_semantics=("parallel",)),
    )(logits_p, tsim_p, eos)
    return jnp.sum(out[:, 0, 0])


# --------------------------------------------------------------------------
# Kernel 2: matched-pair box losses (L1 on cxcyczwhd + 3D GIoU diagonal)
#   lane-dense transposed layout: rows = 6 coords (+ validity row), lanes = N.
# --------------------------------------------------------------------------
def _boxes_kernel(src_ref, tgt_ref, out_ref):
    src = src_ref[...]                             # [8, Np]
    tgt = tgt_ref[...]                             # [8, Np]
    valid = src[6:7]                               # [1, Np] 1.0 real / 0.0 pad

    l1 = (jnp.abs(src[0:3] - tgt[0:3])
          + 0.2 * jnp.abs(src[3:6] - tgt[3:6]))    # [3, Np]
    loss_bbox = jnp.sum(l1 * valid)

    s_whd = jnp.maximum(src[3:6], 1e-6)
    t_whd = jnp.maximum(tgt[3:6], 1e-6)
    s_min = src[0:3] - 0.5 * s_whd
    s_max = src[0:3] + 0.5 * s_whd
    t_min = tgt[0:3] - 0.5 * t_whd
    t_max = tgt[0:3] + 0.5 * t_whd

    i_d = jnp.maximum(jnp.minimum(s_max, t_max) - jnp.maximum(s_min, t_min), 0.0)
    inter = i_d[0:1] * i_d[1:2] * i_d[2:3]                     # [1, Np]
    s_d = s_max - s_min
    t_d = t_max - t_min
    vol_s = s_d[0:1] * s_d[1:2] * s_d[2:3]
    vol_t = t_d[0:1] * t_d[1:2] * t_d[2:3]
    union = vol_s + vol_t - inter
    iou = inter * pl.reciprocal(union, approx=True)

    e_d = jnp.maximum(jnp.maximum(s_max, t_max) - jnp.minimum(s_min, t_min), 0.0)
    evol = e_d[0:1] * e_d[1:2] * e_d[2:3]
    giou = iou - (evol - union) * pl.reciprocal(evol, approx=True)

    out_ref[0, 0] = loss_bbox
    out_ref[0, 1] = jnp.sum((1.0 - giou) * valid)


def boxes_loss(src_boxes, target_boxes):
    n = src_boxes.shape[0]
    npad = max(128, _round_up(n, 128))
    src_t = jnp.zeros((8, npad), jnp.float32)
    src_t = src_t.at[0:6, :n].set(src_boxes.astype(jnp.float32).T)
    src_t = src_t.at[6, :n].set(1.0)               # validity row
    tgt_t = jnp.zeros((8, npad), jnp.float32)
    tgt_t = tgt_t.at[0:6, :n].set(target_boxes.astype(jnp.float32).T)
    out = pl.pallas_call(
        _boxes_kernel,
        out_shape=jax.ShapeDtypeStruct((1, 2), jnp.float32),
        in_specs=[_vmem(), _vmem()],
        out_specs=_smem_out(),
    )(src_t, tgt_t)
    return out[0, 0], out[0, 1]


# --------------------------------------------------------------------------
# Kernel 3: semantic-alignment contrastive loss
#   grid over batch; bf16 embeddings into the MXU; int8 indicator maps;
#   combined weighted positive maps (one reduction per direction).
# --------------------------------------------------------------------------
def _make_sem_align_kernel(temperature):
    inv_t = 1.0 / temperature

    def kernel(img_ref, txt_ref, pos_ref, modi_ref, pron_ref, rel_ref,
               other_ref, mask_ref, tmask_ref, nbobj_ref, out_ref):
        img = img_ref[0]                           # [Q, D] bf16
        txt = txt_ref[0]                           # [L, D] bf16
        logits = lax.dot_general(
            img, txt, (((1,), (1,)), ((), ())),
            preferred_element_type=jnp.float32) * inv_t        # [Q, L] f32

        pos = pos_ref[0].astype(jnp.float32)       # 0/1 indicator maps
        modi = modi_ref[0].astype(jnp.float32)
        pron = pron_ref[0].astype(jnp.float32)
        rel = rel_ref[0].astype(jnp.float32)
        other = other_ref[0].astype(jnp.float32)

        # ---- box -> token (reduce over tokens, axis 1) ----
        n_pos = jnp.sum(pos, axis=1, keepdims=True)            # [Q, 1]
        n_modi = jnp.sum(modi, axis=1, keepdims=True)
        n_pron = jnp.sum(pron, axis=1, keepdims=True)
        n_rel = jnp.sum(rel, axis=1, keepdims=True)
        w = (pos * pl.reciprocal(n_pos + 1e-6, approx=True)
             + modi * (0.2 * pl.reciprocal(n_modi + 1e-6, approx=True))
             + pron * (0.2 * pl.reciprocal(n_pron + 1e-6, approx=True))
             + rel * (0.1 * pl.reciprocal(n_rel + 1e-6, approx=True)))
        pos_term = -jnp.sum(logits * w, axis=1, keepdims=True)             # [Q, 1]
        neg_in = logits * (1.0 + other)            # logits + other-masked logits
        m2 = jnp.max(neg_in, axis=1, keepdims=True)
        neg_term = jnp.log(jnp.sum(jnp.exp(neg_in - m2), axis=1,
                                   keepdims=True)) + m2                    # [Q, 1]
        b2t = jnp.where(n_pos > 0.0, pos_term + neg_term, 0.0)
        box_to_token = jnp.sum(b2t * mask_ref[0])              # mask_ref[0]: [Q,1]

        # ---- token -> box (reduce over queries, axis 0) ----
        s_ind = pos + modi + pron + rel                        # [Q, L]
        pos_term_t = -jnp.sum(logits * s_ind, axis=0, keepdims=True)       # [1, L]
        m1 = jnp.max(logits, axis=0, keepdims=True)
        neg_term_t = jnp.log(jnp.sum(jnp.exp(logits - m1), axis=0,
                                     keepdims=True)) + m1                  # [1, L]
        tokens_with_pos = jnp.sum(s_ind, axis=0, keepdims=True) > 0.0      # [1, L]
        nbobj = nbobj_ref[0]                       # [1, L], includes +1e-6
        inv_nb = pl.reciprocal(nbobj, approx=True)
        entropy = -jnp.log(nbobj + 1e-6) * inv_nb
        t2b = jnp.where(tokens_with_pos,
                        entropy + pos_term_t * inv_nb + neg_term_t, 0.0)
        token_to_box = jnp.sum(t2b * tmask_ref[0])             # tmask_ref[0]: [1,L]

        out_ref[...] = jnp.full((1, 1, 128),
                                (box_to_token + token_to_box) * 0.5,
                                jnp.float32)

    return kernel


def sem_align_loss(img_emb, txt_emb, pos_map, modi_map, pron_map, rel_map,
                   other_map, mask, tmask, temperature):
    B, Q, D = img_emb.shape
    L = txt_emb.shape[1]
    img = img_emb.astype(jnp.bfloat16)
    txt = txt_emb.astype(jnp.bfloat16)
    # int8 indicator maps (4x less HBM traffic than f32); the only place the
    # raw float map values matter (nb_pos_obj) is precomputed exactly below.
    pos_i8 = (pos_map > 0).astype(jnp.int8)
    modi_i8 = (modi_map > 0).astype(jnp.int8)
    pron_i8 = (pron_map > 0).astype(jnp.int8)
    rel_i8 = (rel_map > 0).astype(jnp.int8)
    other_i8 = (other_map > 0).astype(jnp.int8)
    nb_pos_obj = ((pos_map > 0).astype(jnp.float32).sum(1)
                  + modi_map.astype(jnp.float32).sum(1)
                  + pron_map.astype(jnp.float32).sum(1)
                  + rel_map.astype(jnp.float32).sum(1) + 1e-6).reshape(B, 1, L)
    mask3 = mask.astype(jnp.float32).reshape(B, Q, 1)
    tmask3 = tmask.astype(jnp.float32).reshape(B, 1, L)

    ql = lambda b: (b, 0, 0)
    out = pl.pallas_call(
        _make_sem_align_kernel(temperature),
        out_shape=jax.ShapeDtypeStruct((B, 1, 128), jnp.float32),
        grid=(B,),
        in_specs=[pl.BlockSpec((1, Q, D), ql),
                  pl.BlockSpec((1, L, D), ql),
                  pl.BlockSpec((1, Q, L), ql),
                  pl.BlockSpec((1, Q, L), ql),
                  pl.BlockSpec((1, Q, L), ql),
                  pl.BlockSpec((1, Q, L), ql),
                  pl.BlockSpec((1, Q, L), ql),
                  pl.BlockSpec((1, Q, 1), ql),
                  pl.BlockSpec((1, 1, L), ql),
                  pl.BlockSpec((1, 1, L), ql)],
        out_specs=pl.BlockSpec((1, 1, 128), ql),
        compiler_params=pltpu.CompilerParams(
            dimension_semantics=("parallel",)),
    )(img, txt, pos_i8, modi_i8, pron_i8, rel_i8, other_i8,
      mask3, tmask3, nb_pos_obj)
    return jnp.sum(out[:, 0, 0])


# --------------------------------------------------------------------------
# SetCriterion (JAX orchestration; Pallas kernels for the heavy math)
# --------------------------------------------------------------------------
class SimpleDeterministicMatcher:
    """Deterministic stand-in for the Hungarian matcher: target j -> query (5j+1) % Q."""

    def __init__(self, num_queries):
        self.num_queries = num_queries

    def __call__(self, outputs, targets):
        indices = []
        for t in targets:
            n = t['boxes'].shape[0]
            src = (jnp.arange(n, dtype=jnp.int32) * 5 + 1) % self.num_queries
            tgt = jnp.arange(n, dtype=jnp.int32)
            indices.append((src, tgt))
        return indices


class SetCriterion:
    def __init__(self, matcher, losses=('boxes', 'labels', 'contrastive_align'),
                 eos_coef=0.1, temperature=0.07):
        self.matcher = matcher
        self.eos_coef = eos_coef
        self.losses = list(losses)
        self.temperature = temperature

    @staticmethod
    def _get_src_permutation_idx(indices):
        batch_idx = jnp.concatenate(
            [jnp.full_like(src, i) for i, (src, _) in enumerate(indices)])
        src_idx = jnp.concatenate([src for src, _ in indices])
        return batch_idx, src_idx

    def loss_pos_align(self, outputs, targets, indices, num_boxes, auxi_indices):
        logits = outputs['pred_logits']                        # [B, Q, C]
        B, Q, C = logits.shape
        positive_map = jnp.concatenate([t['positive_map'] for t in targets], 0)
        modify_map = jnp.concatenate([t['modify_positive_map'] for t in targets], 0)
        pron_map = jnp.concatenate([t['pron_positive_map'] for t in targets], 0)
        rel_map = jnp.concatenate([t['rel_positive_map'] for t in targets], 0)

        batch_idx, src_idx = self._get_src_permutation_idx(indices)
        tgt_idx, offset = [], 0
        for i, (_, tgt) in enumerate(indices):
            tgt_idx.append(tgt + offset)
            offset += targets[i]['boxes'].shape[0]
        tgt_idx = jnp.concatenate(tgt_idx)

        tgt_pos = positive_map[tgt_idx]
        mod_pos = modify_map[tgt_idx]
        pron_pos = pron_map[tgt_idx]
        rel_pos = rel_map[tgt_idx]
        tgt_weight_pos = tgt_pos * 0.6 + mod_pos * 0.2 + pron_pos * 0.2 + rel_pos * 0.1
        if outputs['language_dataset'][0] == 'sr3d':
            tgt_weight_pos = (tgt_pos * 0.625 + mod_pos * 0.125
                              + pron_pos * 0.125 + rel_pos * 0.125)
        # target_mask / other_entity_map in the reference are computed but never
        # used by loss_ce, so they are skipped here.
        target_sim = jnp.zeros((B, Q, C), jnp.float32)
        target_sim = target_sim.at[:, :, -1].set(1.0)
        target_sim = target_sim.at[batch_idx, src_idx].set(tgt_weight_pos)
        eos = jnp.full((B, Q), self.eos_coef, jnp.float32)
        eos = eos.at[batch_idx, src_idx].set(1.0)
        loss_ce = pos_align_loss(logits, target_sim, eos) / num_boxes
        return {'loss_ce': loss_ce}

    def loss_boxes(self, outputs, targets, indices, num_boxes, auxi_indices):
        batch_idx, src_idx = self._get_src_permutation_idx(indices)
        src_boxes = outputs['pred_boxes'][batch_idx, src_idx]  # [N, 6]
        target_boxes = jnp.concatenate(
            [t['boxes'][i] for t, (_, i) in zip(targets, indices)], axis=0)
        l1_sum, giou_sum = boxes_loss(src_boxes, target_boxes)
        return {'loss_bbox': l1_sum / num_boxes, 'loss_giou': giou_sum / num_boxes}

    def loss_sem_align(self, outputs, targets, indices, num_boxes, auxi_indices):
        attn = outputs['tokenized']['attention_mask']          # [B, L]
        txt = outputs['proj_tokens']                           # [B, L, D]
        img = outputs['proj_queries']                          # [B, Q, D]
        B, Q, _ = img.shape
        L = txt.shape[1]
        inds = attn.sum(1) - 1
        ar = jnp.arange(B)
        batch_idx, src_idx = self._get_src_permutation_idx(indices)

        positive_map = jnp.zeros((B, Q, L), jnp.float32)
        positive_map = positive_map.at[ar, :, inds].set(0.5)
        positive_map = positive_map.at[ar, :, inds - 1].set(0.5)
        pmap = jnp.concatenate(
            [t['positive_map'][i] for t, (_, i) in zip(targets, indices)],
            axis=0)[..., :L]
        positive_map = positive_map.at[batch_idx, src_idx].set(pmap)

        def scatter_map(key):
            p = jnp.concatenate(
                [t[key][i] for t, (_, i) in zip(targets, indices)], axis=0)[..., :L]
            return jnp.zeros((B, Q, L), jnp.float32).at[batch_idx, src_idx].set(p)

        modi_map = scatter_map('modify_positive_map')
        pron_map = scatter_map('pron_positive_map')
        other_map = scatter_map('other_entity_map')
        rel_map = scatter_map('rel_positive_map')

        mask = jnp.full((B, Q), self.eos_coef, jnp.float32)
        mask = mask.at[batch_idx, src_idx].set(1.0)
        tmask = jnp.full((B, L), self.eos_coef, jnp.float32)
        tmask = tmask.at[ar, inds].set(1.0)
        tmask = jnp.where(jnp.any(positive_map > 0, axis=1), 1.0, tmask)
        tmask = jnp.where(jnp.any(modi_map > 0, axis=1), 0.2, tmask)
        tmask = jnp.where(jnp.any(pron_map > 0, axis=1), 0.2, tmask)
        tmask = jnp.where(jnp.any(rel_map > 0, axis=1), 0.1, tmask)
        tmask = tmask.at[ar, inds - 1].set(0.1)

        tot = sem_align_loss(img, txt, positive_map, modi_map, pron_map,
                             rel_map, other_map, mask, tmask, self.temperature)
        return {'loss_sem_align': tot / num_boxes}

    def get_loss(self, loss, outputs, targets, indices, num_boxes, auxi_indices):
        loss_map = {'boxes': self.loss_boxes, 'labels': self.loss_pos_align,
                    'contrastive_align': self.loss_sem_align}
        assert loss in loss_map, f'do you really want to compute {loss} loss?'
        return loss_map[loss](outputs, targets, indices, num_boxes, auxi_indices)

    def forward(self, outputs, targets):
        indices = self.matcher(outputs, targets)
        auxi_target = [{'labels': targets[b]['labels'],
                        'boxes': targets[b]['auxi_box'],
                        'positive_map': targets[b]['auxi_entity_positive_map']}
                       for b in range(outputs['pred_boxes'].shape[0])]
        auxi_indices = self.matcher(outputs, auxi_target)
        num_boxes = float(sum(int(inds[1].shape[0]) for inds in indices))
        # TODO(synk): torch.distributed all_reduce of num_boxes skipped (single host).
        losses = {}
        for loss in self.losses:
            losses.update(self.get_loss(loss, outputs, targets, indices,
                                        num_boxes, auxi_indices))
        return losses, indices

    __call__ = forward


if __name__ == "__main__":
    B, Q, C, L, D, n_obj = 2, 16, 16, 16, 32, 3
    key = jax.random.PRNGKey(0)
    ks = jax.random.split(key, 8)

    pred_logits = jax.random.normal(ks[0], (B, Q, C), jnp.float32)
    centers = jax.random.uniform(ks[1], (B, Q, 3), minval=0.1, maxval=0.9)
    sizes = jax.random.uniform(ks[2], (B, Q, 3), minval=0.05, maxval=0.3)
    pred_boxes = jnp.concatenate([centers, sizes], axis=-1)

    def _norm(x):
        return x / jnp.linalg.norm(x, axis=-1, keepdims=True)

    proj_queries = _norm(jax.random.normal(ks[3], (B, Q, D), jnp.float32))
    proj_tokens = _norm(jax.random.normal(ks[4], (B, L, D), jnp.float32))
    lengths = jnp.array([10, 12], jnp.int32)
    attention_mask = (jnp.arange(L)[None, :] < lengths[:, None]).astype(jnp.int32)

    outputs = {
        'pred_logits': pred_logits,
        'pred_boxes': pred_boxes,
        'proj_tokens': proj_tokens,
        'proj_queries': proj_queries,
        'tokenized': {'attention_mask': attention_mask},
        'language_dataset': ['scanrefer'],
    }

    targets = []
    for b in range(B):
        kb = jax.random.split(jax.random.fold_in(key, 100 + b), 2)
        tc = jax.random.uniform(kb[0], (n_obj, 3), minval=0.1, maxval=0.9)
        ts = jax.random.uniform(kb[1], (n_obj, 3), minval=0.05, maxval=0.3)
        boxes = jnp.concatenate([tc, ts], axis=-1)
        j = jnp.arange(n_obj)
        pos = jnp.zeros((n_obj, C), jnp.float32)
        pos = pos.at[j, 2 * j + 1].set(0.5).at[j, 2 * j + 2].set(0.5)
        modi = jnp.zeros((n_obj, C), jnp.float32).at[j, 0].set(jnp.array([1.0, 0.0, 1.0]))
        pron = jnp.zeros((n_obj, C), jnp.float32).at[j, 7].set(jnp.array([0.0, 1.0, 0.0]))
        other = jnp.zeros((n_obj, C), jnp.float32).at[j, 9].set(jnp.array([1.0, 1.0, 0.0]))
        rel = jnp.zeros((n_obj, C), jnp.float32).at[j, 5].set(jnp.array([0.5, 0.5, 1.0]))
        targets.append({
            'boxes': boxes,
            'labels': jnp.arange(n_obj, dtype=jnp.int32),
            'positive_map': pos,
            'modify_positive_map': modi,
            'pron_positive_map': pron,
            'other_entity_map': other,
            'rel_positive_map': rel,
            'auxi_box': boxes,
            'auxi_entity_positive_map': pos,
        })

    matcher = SimpleDeterministicMatcher(num_queries=Q)
    criterion = SetCriterion(matcher,
                             losses=['boxes', 'labels', 'contrastive_align'],
                             eos_coef=0.1, temperature=0.07)
    losses, indices = criterion(outputs, targets)
    losses = {k: float(jax.block_until_ready(v)) for k, v in losses.items()}
    print("KERNEL_OK")
</pallas_src>

<mosaic_0001>
module attributes {stable_mosaic.version = 11 : i64} {
  func.func @_boxes_kernel(%arg0: memref<8x128xf32, #tpu.memory_space<vmem>>, %arg1: memref<8x128xf32, #tpu.memory_space<vmem>>, %arg2: memref<1x2xf32, #tpu.memory_space<smem>>) attributes {dimension_semantics = [], scalar_prefetch = 0 : i64, scratch_operands = 0 : i64, tpu.core_type = #tpu.core_type<tc>} {
    %c0 = arith.constant 0 : index
    %c0_0 = arith.constant 0 : index
    %0 = vector.load %arg0[%c0, %c0_0] : memref<8x128xf32, #tpu.memory_space<vmem>>, vector<8x128xf32>
    %c0_1 = arith.constant 0 : index
    %c0_2 = arith.constant 0 : index
    %1 = vector.load %arg1[%c0_1, %c0_2] : memref<8x128xf32, #tpu.memory_space<vmem>>, vector<8x128xf32>
    %2 = vector.extract_strided_slice %0 {offsets = [6, 0], sizes = [1, 128], strides = [1, 1]} : vector<8x128xf32> to vector<1x128xf32>
    %3 = vector.extract_strided_slice %0 {offsets = [0, 0], sizes = [3, 128], strides = [1, 1]} : vector<8x128xf32> to vector<3x128xf32>
    %4 = vector.extract_strided_slice %1 {offsets = [0, 0], sizes = [3, 128], strides = [1, 1]} : vector<8x128xf32> to vector<3x128xf32>
    %5 = arith.subf %3, %4 : vector<3x128xf32>
    %6 = math.absf %5 : vector<3x128xf32>
    %7 = vector.extract_strided_slice %0 {offsets = [3, 0], sizes = [3, 128], strides = [1, 1]} : vector<8x128xf32> to vector<3x128xf32>
    %8 = vector.extract_strided_slice %1 {offsets = [3, 0], sizes = [3, 128], strides = [1, 1]} : vector<8x128xf32> to vector<3x128xf32>
    %9 = arith.subf %7, %8 : vector<3x128xf32>
    %10 = math.absf %9 : vector<3x128xf32>
    %cst = arith.constant 2.000000e-01 : f32
    %11 = vector.broadcast %cst : f32 to vector<3x128xf32>
    %12 = arith.mulf %11, %10 : vector<3x128xf32>
    %13 = arith.addf %6, %12 : vector<3x128xf32>
    %14 = vector.broadcast %2 : vector<1x128xf32> to vector<3x128xf32>
    %15 = arith.mulf %13, %14 : vector<3x128xf32>
    %16 = vector.shape_cast %15 : vector<3x128xf32> to vector<1x3x128xf32>
    %cst_3 = arith.constant dense<0.000000e+00> : vector<1xf32>
    %17 = vector.multi_reduction <add>, %16, %cst_3 [1, 2] : vector<1x3x128xf32> to vector<1xf32>
    %18 = vector.shape_cast %17 : vector<1xf32> to vector<1x1x1xf32>
    %19 = vector.extract %18[0, 0, 0] : f32 from vector<1x1x1xf32>
    %20 = vector.extract_strided_slice %0 {offsets = [3, 0], sizes = [3, 128], strides = [1, 1]} : vector<8x128xf32> to vector<3x128xf32>
    %cst_4 = arith.constant 9.99999997E-7 : f32
    %21 = vector.broadcast %cst_4 : f32 to vector<3x128xf32>
    %22 = arith.maximumf %20, %21 : vector<3x128xf32>
    %23 = vector.extract_strided_slice %1 {offsets = [3, 0], sizes = [3, 128], strides = [1, 1]} : vector<8x128xf32> to vector<3x128xf32>
    %cst_5 = arith.constant 9.99999997E-7 : f32
    %24 = vector.broadcast %cst_5 : f32 to vector<3x128xf32>
    %25 = arith.maximumf %23, %24 : vector<3x128xf32>
    %26 = vector.extract_strided_slice %0 {offsets = [0, 0], sizes = [3, 128], strides = [1, 1]} : vector<8x128xf32> to vector<3x128xf32>
    %cst_6 = arith.constant 5.000000e-01 : f32
    %27 = vector.broadcast %cst_6 : f32 to vector<3x128xf32>
    %28 = arith.mulf %27, %22 : vector<3x128xf32>
    %29 = arith.subf %26, %28 : vector<3x128xf32>
    %30 = vector.extract_strided_slice %0 {offsets = [0, 0], sizes = [3, 128], strides = [1, 1]} : vector<8x128xf32> to vector<3x128xf32>
    %cst_7 = arith.constant 5.000000e-01 : f32
    %31 = vector.broadcast %cst_7 : f32 to vector<3x128xf32>
    %32 = arith.mulf %31, %22 : vector<3x128xf32>
    %33 = arith.addf %30, %32 : vector<3x128xf32>
    %34 = vector.extract_strided_slice %1 {offsets = [0, 0], sizes = [3, 128], strides = [1, 1]} : vector<8x128xf32> to vector<3x128xf32>
    %cst_8 = arith.constant 5.000000e-01 : f32
    %35 = vector.broadcast %cst_8 : f32 to vector<3x128xf32>
    %36 = arith.mulf %35, %25 : vector<3x128xf32>
    %37 = arith.subf %34, %36 : vector<3x128xf32>
    %38 = vector.extract_strided_slice %1 {offsets = [0, 0], sizes = [3, 128], strides = [1, 1]} : vector<8x128xf32> to vector<3x128xf32>
    %cst_9 = arith.constant 5.000000e-01 : f32
    %39 = vector.broadcast %cst_9 : f32 to vector<3x128xf32>
    %40 = arith.mulf %39, %25 : vector<3x128xf32>
    %41 = arith.addf %38, %40 : vector<3x128xf32>
    %42 = arith.minimumf %33, %41 : vector<3x128xf32>
    %43 = arith.maximumf %29, %37 : vector<3x128xf32>
    %44 = arith.subf %42, %43 : vector<3x128xf32>
    %cst_10 = arith.constant 0.000000e+00 : f32
    %45 = vector.broadcast %cst_10 : f32 to vector<3x128xf32>
    %46 = arith.maximumf %44, %45 : vector<3x128xf32>
    %47 = vector.extract_strided_slice %46 {offsets = [0, 0], sizes = [1, 128], strides = [1, 1]} : vector<3x128xf32> to vector<1x128xf32>
    %48 = vector.extract_strided_slice %46 {offsets = [1, 0], sizes = [1, 128], strides = [1, 1]} : vector<3x128xf32> to vector<1x128xf32>
    %49 = arith.mulf %47, %48 : vector<1x128xf32>
    %50 = vector.extract_strided_slice %46 {offsets = [2, 0], sizes = [1, 128], strides = [1, 1]} : vector<3x128xf32> to vector<1x128xf32>
    %51 = arith.mulf %49, %50 : vector<1x128xf32>
    %52 = arith.subf %33, %29 : vector<3x128xf32>
    %53 = arith.subf %41, %37 : vector<3x128xf32>
    %54 = vector.extract_strided_slice %52 {offsets = [0, 0], sizes = [1, 128], strides = [1, 1]} : vector<3x128xf32> to vector<1x128xf32>
    %55 = vector.extract_strided_slice %52 {offsets = [1, 0], sizes = [1, 128], strides = [1, 1]} : vector<3x128xf32> to vector<1x128xf32>
    %56 = arith.mulf %54, %55 : vector<1x128xf32>
    %57 = vector.extract_strided_slice %52 {offsets = [2, 0], sizes = [1, 128], strides = [1, 1]} : vector<3x128xf32> to vector<1x128xf32>
    %58 = arith.mulf %56, %57 : vector<1x128xf32>
    %59 = vector.extract_strided_slice %53 {offsets = [0, 0], sizes = [1, 128], strides = [1, 1]} : vector<3x128xf32> to vector<1x128xf32>
    %60 = vector.extract_strided_slice %53 {offsets = [1, 0], sizes = [1, 128], strides = [1, 1]} : vector<3x128xf32> to vector<1x128xf32>
    %61 = arith.mulf %59, %60 : vector<1x128xf32>
    %62 = vector.extract_strided_slice %53 {offsets = [2, 0], sizes = [1, 128], strides = [1, 1]} : vector<3x128xf32> to vector<1x128xf32>
    %63 = arith.mulf %61, %62 : vector<1x128xf32>
    %64 = arith.addf %58, %63 : vector<1x128xf32>
    %65 = arith.subf %64, %51 : vector<1x128xf32>
    %66 = tpu.reciprocal %65 {approx = true} : vector<1x128xf32> -> vector<1x128xf32>
    %67 = arith.mulf %51, %66 : vector<1x128xf32>
    %68 = arith.maximumf %33, %41 : vector<3x128xf32>
    %69 = arith.minimumf %29, %37 : vector<3x128xf32>
    %70 = arith.subf %68, %69 : vector<3x128xf32>
    %cst_11 = arith.constant 0.000000e+00 : f32
    %71 = vector.broadcast %cst_11 : f32 to vector<3x128xf32>
    %72 = arith.maximumf %70, %71 : vector<3x128xf32>
    %73 = vector.extract_strided_slice %72 {offsets = [0, 0], sizes = [1, 128], strides = [1, 1]} : vector<3x128xf32> to vector<1x128xf32>
    %74 = vector.extract_strided_slice %72 {offsets = [1, 0], sizes = [1, 128], strides = [1, 1]} : vector<3x128xf32> to vector<1x128xf32>
    %75 = arith.mulf %73, %74 : vector<1x128xf32>
    %76 = vector.extract_strided_slice %72 {offsets = [2, 0], sizes = [1, 128], strides = [1, 1]} : vector<3x128xf32> to vector<1x128xf32>
    %77 = arith.mulf %75, %76 : vector<1x128xf32>
    %78 = arith.subf %77, %65 : vector<1x128xf32>
    %79 = tpu.reciprocal %77 {approx = true} : vector<1x128xf32> -> vector<1x128xf32>
    %80 = arith.mulf %78, %79 : vector<1x128xf32>
    %81 = arith.subf %67, %80 : vector<1x128xf32>
    %c0_12 = arith.constant 0 : index
    %c0_13 = arith.constant 0 : index
    %82 = memref.load %arg2[%c0_12, %c0_13] : memref<1x2xf32, #tpu.memory_space<smem>>
    memref.store %19, %arg2[%c0_12, %c0_13] : memref<1x2xf32, #tpu.memory_space<smem>>
    %cst_14 = arith.constant 1.000000e+00 : f32
    %83 = vector.broadcast %cst_14 : f32 to vector<1x128xf32>
    %84 = arith.subf %83, %81 : vector<1x128xf32>
    %85 = arith.mulf %84, %2 : vector<1x128xf32>
    %86 = vector.shape_cast %85 : vector<1x128xf32> to vector<1x1x128xf32>
    %cst_15 = arith.constant dense<0.000000e+00> : vector<1xf32>
    %87 = vector.multi_reduction <add>, %86, %cst_15 [1, 2] : vector<1x1x128xf32> to vector<1xf32>
    %88 = vector.shape_cast %87 : vector<1xf32> to vector<1x1x1xf32>
    %89 = vector.extract %88[0, 0, 0] : f32 from vector<1x1x1xf32>
    %c0_16 = arith.constant 0 : index
    %c1 = arith.constant 1 : index
    %90 = memref.load %arg2[%c0_16, %c1] : memref<1x2xf32, #tpu.memory_space<smem>>
    memref.store %89, %arg2[%c0_16, %c1] : memref<1x2xf32, #tpu.memory_space<smem>>
    return
  }
}

</mosaic_0001>

<bundles_post_ra>
// kernel: tpu_custom_call.1
= control target key start
LH: loop header
LB: loop body
LE: loop exit
PB: predicated region body
PF: predicated region fallthrough
CT: control target
= control target key end

     0   :  { %7 = vsyncpa [#allocation3], 0  ;;  %s289_s0 = inlined_call_operand.hbm [shape: f32[8,128], index: 0, kind: input, shape index: {}]   ;;  %s290_s1 = inlined_call_operand.hbm [shape: f32[8,128], index: 1, kind: input, shape index: {}]   ;;  %s291_s2 = inlined_call_operand.hbm [shape: f32[1,2], index: 2, kind: output, shape index: {}]  }
   0x1   :  { %8 = vsyncpa [#allocation6], 0 }
   0x2   :  { %9 = vsyncpa [#allocation4], 0  ;;  %s227_s9 = smov [#allocation2]   ;;  %s228_s11 = smov [#allocation5]  }
   0x3   :  { %s16_s10 = sshll.u32 %s227_s9, 4  ;;  %s26_s12 = sshll.u32 %s228_s11, 4  ;;  %s17_s10 = int_to_ptr.vmem [resolvable:$true] %s16_s10  ;;  %s27_s12 = int_to_ptr.vmem [resolvable:$true] %s26_s12 }
   0x4   :  { %s167_s15 = scalar_lea.hbm %s289_s0, 128 }
   0x5   :  { %p168_p0 = scmp.ne.s32.totalorder %s289_s0, %s167_s15  ;;  %p171_p1 = scmp.lt.u32.totalorder %s167_s15, %s289_s0 }
   0x7   :  { %p173_p2 = pnand %p171_p1, %p168_p0 }
   0x9   :  { %176 = shalt.err (!%p173_p2)
}
   0xa   :  { %s177_s20 = scalar_lea.vmem %s17_s10, 128  ;;  %p182_p4 = scmp.lt.s32.totalorder %s17_s10, %s17_s10 }
   0xb   :  { %p178_p3 = scmp.ne.s32.totalorder %s17_s10, %s177_s20  ;;  %p183_p5 = scmp.lt.s32.totalorder %s177_s20, %s177_s20 }
   0xd   :  { %p184_p6 = por %p183_p5, %p182_p4 }
   0xf   :  { %p185_p7 = pnand %p184_p6, %p178_p3 }
  0x11   :  { %188 = shalt.err (!%p185_p7)
}
  0x12   :  { %19 = dma.hbm_to_vmem [thread:$0]  %s289_s0, 128, %s17_s10, [#allocation3]  }
  0x13   :  { %s189_s25 = scalar_lea.hbm %s290_s1, 128 }
  0x14   :  { %p190_p8 = scmp.ne.s32.totalorder %s290_s1, %s189_s25  ;;  %p193_p9 = scmp.lt.u32.totalorder %s189_s25, %s290_s1 }
  0x16   :  { %p195_p10 = pnand %p193_p9, %p190_p8 }
  0x18   :  { %198 = shalt.err (!%p195_p10)
}
  0x19   :  { %s199_s30 = scalar_lea.vmem %s27_s12, 128  ;;  %p204_p12 = scmp.lt.s32.totalorder %s27_s12, %s27_s12 }
  0x1a   :  { %p200_p11 = scmp.ne.s32.totalorder %s27_s12, %s199_s30  ;;  %p205_p13 = scmp.lt.s32.totalorder %s199_s30, %s199_s30 }
  0x1c   :  { %p206_p0 = por %p205_p13, %p204_p12 }
  0x1e   :  { %p207_p1 = pnand %p206_p0, %p200_p11 }
  0x20   :  { %210 = shalt.err (!%p207_p1)
}
  0x21   :  { %29 = dma.hbm_to_vmem [thread:$0]  %s290_s1, 128, %s27_s12, [#allocation6]  }
  0x22   :  { %221 = dma.done.wait [#allocation3], 128  }
  0x23   :  { %222 = vsyncadd [#allocation3], 4294967168 }
  0x24   :  { %223 = dma.done.wait [#allocation6], 128  }
  0x25   :  { %224 = vsyncadd [#allocation6], 4294967168  ;;  %v45_v0 = vlaneseq  ;;  %v269_v2 = vld [vmem:[#allocation2] sm:$0xff]  ;;  %v37_v3 = vld [vmem:[#allocation5] sm:$0xff]  ;;  %vm50_vm0 = vcmask 1042432   ;;  %vm128_vm1 = vcmask 1040384  }
  0x26   :  { %v38_v4 = vsub.f32 %v269_v2, %v37_v3  ;;  %v61_v5 = vmax.f32 %v269_v2, 1e-06  ;;  %v62_v6 = vmax.f32 %v37_v3, 1e-06  ;;  %v125_v57 = vrot.slane %v269_v2, 6  ;;  %s211_s7 = scalar_lea.hbm %s291_s2, 16 }
  0x27   :  { %v46_v1 = vshrl.u32 %v45_v0, 7  ;;  %p212_p2 = scmp.ne.s32.totalorder %s291_s2, %s211_s7  ;;  %p215_p3 = scmp.lt.u32.totalorder %s211_s7, %s291_s2 }
  0x28   :  { %v39_v8 = vand.u32 2147483647, %v38_v4  ;;  %v63_v9 = vmul.f32 0.5, %v61_v5  ;;  %v69_v10 = vmul.f32 0.5, %v62_v6 }
  0x29   :  { %v47_v7 = vsub.s32 6, %v46_v1  ;;  %p217_p4 = pnand %p215_p3, %p212_p2 }
  0x2a   :  { %v40_v11 = vmul.f32 0.2, %v39_v8  ;;  %v65_v12 = vrot.slane %v63_v9, 3  ;;  %v71_v13 = vrot.slane %v69_v10, 3 }
  0x2b   :  { %v48_v14 = vrot.slane %v269_v2, %v47_v7 }
  0x2c   :  { %v42_v15 = vrot.slane %v40_v11, 3  ;;  %v67_v16 = vsub.f32 %v269_v2, %v65_v12  ;;  %v68_v17 = vadd.f32 %v65_v12, %v269_v2  ;;  %v73_v18 = vsub.f32 %v37_v3, %v71_v13 }
  0x2d   :  { %v74_v19 = vadd.f32 %v71_v13, %v37_v3 }
  0x2e   :  { %v44_v20 = vadd.f32 %v42_v15, %v39_v8  ;;  %v107_v21 = vmin.f32 %v67_v16, %v73_v18  ;;  %v76_v22 = vmax.f32 %v67_v16, %v73_v18  ;;  %v86_v23 = vsub.f32 %v68_v17, %v67_v16 }
  0x2f   :  { %v87_v24 = vsub.f32 %v74_v19, %v73_v18  ;;  %v106_v25 = vmax.f32 %v68_v17, %v74_v19  ;;  %v75_v26 = vmin.f32 %v68_v17, %v74_v19 }
  0x30   :  { %v49_v27 = vmul.f32 %v48_v14, %v44_v20  ;;  %v89_v28 = vrot.slane %v86_v23, 1  ;;  %v92_v29 = vrot.slane %v86_v23, 2 }
  0x31   :  { %v77_v30 = vsub.f32 %v75_v26, %v76_v22  ;;  %v96_v31 = vrot.slane %v87_v24, 1  ;;  %v99_v32 = vrot.slane %v87_v24, 2  ;;  %v108_v33 = vsub.f32 %v106_v25, %v107_v21 }
  0x32   :  { %v51_v34 = vsel %vm50_vm0, %v49_v27, 0.0  ;;  %v91_v35 = vmul.f32 %v89_v28, %v86_v23 }
  0x33   :  { %52 = vadd.xlane.f32.xlu0 %v51_v34  ;;  %v78_v36 = vmax.f32 %v77_v30, 0.0  ;;  %v98_v37 = vmul.f32 %v96_v31, %v87_v24  ;;  %v109_v38 = vmax.f32 %v108_v33, 0.0 }
  0x34   :  { %v94_v39 = vmul.f32 %v92_v29, %v91_v35 }
  0x35   :  { %v80_v40 = vrot.slane %v78_v36, 1  ;;  %v83_v41 = vrot.slane %v78_v36, 2  ;;  %v101_v42 = vmul.f32 %v99_v32, %v98_v37  ;;  %v111_v43 = vrot.slane %v109_v38, 1 }
  0x36   :  { %v114_v44 = vrot.slane %v109_v38, 2 }
  0x37   :  { %v82_v45 = vmul.f32 %v80_v40, %v78_v36  ;;  %v102_v46 = vadd.f32 %v101_v42, %v94_v39  ;;  %v113_v47 = vmul.f32 %v111_v43, %v109_v38 }
  0x39   :  { %v85_v48 = vmul.f32 %v83_v41, %v82_v45  ;;  %v116_v49 = vmul.f32 %v114_v44, %v113_v47 }
  0x3b   :  { %v103_v50 = vsub.f32 %v102_v46, %v85_v48  ;;  %163 = vrcp.f32 %v116_v49 }
  0x3d   :  { %165 = vrcp.f32 %v103_v50  ;;  %v117_v51 = vsub.f32 %v116_v49, %v103_v50 }
  0x45   :  { %v164_v52 = vpop.eup %163 }
  0x46   :  { %v119_v53 = vmul.f32 %v164_v52, %v117_v51 }
  0x47   :  { %v166_v54 = vpop.eup %165 }
  0x48   :  { %v105_v55 = vmul.f32 %v166_v54, %v85_v48 }
  0x4a   :  { %v120_v56 = vsub.f32 %v105_v55, %v119_v53 }
  0x4c   :  { %v123_v58 = vsub.f32 1.0, %v120_v56 }
  0x4e   :  { %v127_v59 = vmul.f32 %v125_v57, %v123_v58 }
  0x50   :  { %v129_v60 = vsel %vm128_vm1, %v127_v59, 0.0 }
  0x51   :  { %130 = vadd.xlane.f32.xlu0 %v129_v60 }
  0xc0   :  { %v53_v61 = vpop.xlane.xlu0 %52 }
  0xc1   :  { %v54_v62 = vrot.slane %v53_v61, 4 }
  0xc3   :  { %v55_v63 = vadd.f32 %v54_v62, %v53_v61 }
  0xc5   :  { %v56_v0 = vrot.slane %v55_v63, 2 }
  0xc7   :  { %v57_v1 = vadd.f32 %v56_v0, %v55_v63 }
  0xc9   :  { %v58_v3 = vrot.slane %v57_v1, 1 }
  0xcb   :  { %v59_v4 = vadd.f32 %v58_v3, %v57_v1 }
  0xcd   :  { %156 = vpush %v59_v4 }
  0xde   :  { %v131_v5 = vpop.xlane.xlu0 %130 }
  0xdf   :  { %v132_v6 = vrot.slane %v131_v5, 4 }
  0xe1   :  { %v133_v7 = vadd.f32 %v132_v6, %v131_v5 }
  0xe3   :  { %v134_v8 = vrot.slane %v133_v7, 2 }
  0xe5   :  { %v135_v9 = vadd.f32 %v134_v8, %v133_v7 }
  0xe7   :  { %v136_v10 = vrot.slane %v135_v9, 1 }
  0xe9   :  { %v137_v2 = vadd.f32 %v136_v10, %v135_v9 }
  0xeb   :  { %158 = vpush %v137_v2 }
  0xfe   :  { %s157_s1 = spop %156 }
  0xff   :  { %122 = sst [smem:[#allocation7]] %s157_s1 }
 0x11c   :  { %s159_s4 = spop %158 }
 0x11d   :  { %140 = sst [smem:[#allocation7 + $0x1]] %s159_s4 }
 0x11e   :  { %220 = shalt.err (!%p217_p4)
}
 0x11f   :  { %s229_s12 = smov [#allocation7]  }
 0x120   :  { %148 = dma.smem_to_hbm %s229_s12, 16, %s291_s2, [#allocation4]  }
 0x121   :  { %225 = dma.done.wait [#allocation4], 16  }
 0x122   :  { %226 = vsyncadd [#allocation4], 4294967280 }
 0x123   :  { %152 = sfence }
 0x124   :  { %153 = vsyncpa [#allocation3], 1 }
 0x125   :  { %154 = vsyncpa [#allocation6], 1 }
 0x126   :  { %155 = vsyncpa [#allocation4], 1 }

</bundles_post_ra>
